<compile_context>
chip_gen: v7x
topology: tpu7x:2x2x1
jax: 0.10.0
libtpu: 0.0.40
codegen_flags: <defaults>
</compile_context>

<pallas_src>
import math

import jax
import jax.numpy as jnp
from jax import lax
from jax.experimental import pallas as pl
from jax.experimental.pallas import tpu as pltpu

# ----------------------------- config (small) -----------------------------
VOCAB = 50
EMB = 16
HIDDEN = 32
NUM_LAYERS = 1          # TODO(synk): only num_layers=1 implemented (stacked layers need full seq outputs)
BIDIRECTIONAL = True
NUM_CLASSES = 4
BATCH = 2
SEQ = 8

V_PAD = -(-VOCAB // 64) * 64        # bf16-friendly row pad; 2*V_PAD == one 128-lane tile here
OUT_PAD = 128                       # lane-dense classifier output width


# ------------------------------ Pallas kernel ------------------------------
def bilstm_kernel(idf_ref, idr_ref, tab_ref, whh_ref, wlin_ref, blin_ref, out_ref):
    # idf_ref : (T*Bp, 1) int32   forward token ids, time-major (row = t*Bp + b)
    # idr_ref : (T*Bp, 1) int32   time-reversed token ids, pre-offset by V_PAD
    # tab_ref : (2*V_PAD, 8H) bf16  [emb@Wih_fwd + fused biases ; emb@Wih_bwd], gate order i,f,o,g (dir-minor)
    # whh_ref : (2H, 8H)  bf16    block-diagonal recurrent weight, same column layout
    # wlin_ref: (2H, 128) bf16    classifier weight (acts on [h_f | h_b]), zero-padded lanes
    # blin_ref: (1, 128)  f32
    # out_ref : (Bp, 128) f32
    TB = idf_ref.shape[0]
    V2 = tab_ref.shape[0]
    H2 = whh_ref.shape[0]            # 2 * hidden  ([fwd | bwd] fused state width)
    H6 = 3 * H2                      # width of the sigmoid gates i,f,o
    Bp = out_ref.shape[0]
    T = TB // Bp

    # ---- hoisted: embedding gather + input projection + fwd/bwd add, ONE MXU matmul ----
    idf = idf_ref[...]                                            # (TB, 1) int32
    idr = idr_ref[...]                                            # (TB, 1) int32, already + V_PAD
    iota = lax.broadcasted_iota(jnp.int32, (TB, V2), 1)
    onehot = jnp.where((iota == idf) | (iota == idr), 1.0, 0.0).astype(jnp.bfloat16)
    # gin_all[t*Bp + b] = x_t @ Wih_f + x_{T-1-t} @ Wih_b + (all biases), for every step.
    gin_all = jnp.dot(onehot, tab_ref[...],
                      preferred_element_type=jnp.float32)         # (TB, 8H) f32

    whh = whh_ref[...]                                            # (2H, 8H) bf16, loop-invariant RHS

    # Fused state: first H lanes = forward direction, last H = backward.
    h = jnp.zeros((Bp, H2), jnp.float32)
    c = jnp.zeros((Bp, H2), jnp.float32)

    # ---- fully unrolled recurrence: one fused (Bp,2H)@(2H,8H) matmul per step ----
    for t in range(T):
        gates = gin_all[t * Bp:(t + 1) * Bp, :] + jnp.dot(
            h.astype(jnp.bfloat16), whh, preferred_element_type=jnp.float32)   # (Bp, 8H) f32
        # Gate layout: [ i | f | o | g ], each 2H wide (direction-minor).
        # sigmoid(x) == 0.5*(tanh(0.5x)+1): a single native EUP op over the i/f/o block.
        sg = 0.5 * (jnp.tanh(0.5 * gates[:, :H6]) + 1.0)
        i = sg[:, 0:H2]
        f = sg[:, H2:2 * H2]
        o = sg[:, 2 * H2:H6]
        g = jnp.tanh(gates[:, H6:])
        c = f * c + i * g
        h = o * jnp.tanh(c)

    # h == concat(forward final hidden, backward final hidden)  (Bp, 2H)
    # Lane-dense (Bp, 128) store; real logits live in the first C lanes.
    out_ref[...] = (jnp.dot(h.astype(jnp.bfloat16), wlin_ref[...],
                            preferred_element_type=jnp.float32)
                    + blin_ref[...])


# --------------------------- one-time weight folding ------------------------
def _interleave_gates(wf, wb, H):
    """(R,4H),(R,4H) -> (R,8H): gate-major order [i, f, o, g], direction-minor.

    PyTorch packs the 4H axis as [i, f, g, o]; we reorder to put the three
    sigmoid gates first so the kernel applies sigmoid to one contiguous slab.
    """
    parts = []
    for g in (0, 1, 3, 2):                       # i, f, o, g
        parts.append(wf[:, g * H:(g + 1) * H])
        parts.append(wb[:, g * H:(g + 1) * H])
    return jnp.concatenate(parts, axis=1)


def prepare_params(params):
    """Fold/transpose/interleave/pad the PyTorch-layout weights once (inference prep)."""
    (emb_table, wih_f, whh_f, bih_f, bhh_f,
     wih_b, whh_b, bih_b, bhh_b, wlin, blin) = params
    H = HIDDEN
    E = emb_table.shape[1]
    V = emb_table.shape[0]
    C = wlin.shape[0]

    z_e = jnp.zeros((E, 4 * H), jnp.float32)
    w_in_f = _interleave_gates(wih_f.T.astype(jnp.float32), z_e, H)      # (E, 8H), bwd cols zero
    w_in_b = _interleave_gates(z_e, wih_b.T.astype(jnp.float32), H)      # (E, 8H), fwd cols zero
    bias_fused = _interleave_gates((bih_f + bhh_f)[None, :],
                                   (bih_b + bhh_b)[None, :], H)          # (1, 8H), all biases

    # Fold embedding table through the input projections.  Every gin row later
    # selects exactly one row of each half, so fusing the full bias into the
    # forward half adds it exactly once.
    tab_f = emb_table.astype(jnp.float32) @ w_in_f + bias_fused          # (V, 8H)
    tab_b = emb_table.astype(jnp.float32) @ w_in_b                       # (V, 8H)

    pad = jnp.zeros((V_PAD - V, 8 * H), jnp.float32)
    tab_f = jnp.concatenate([tab_f, pad], axis=0)                        # (V_PAD, 8H)
    tab_b = jnp.concatenate([tab_b, pad], axis=0)
    tab_stack = jnp.concatenate([tab_f, tab_b], axis=0)                  # (2*V_PAD, 8H)

    z_h = jnp.zeros((H, 4 * H), jnp.float32)
    whh_blk = _interleave_gates(
        jnp.concatenate([whh_f.T.astype(jnp.float32), z_h], axis=0),     # rows 0:H  <- h_f
        jnp.concatenate([z_h, whh_b.T.astype(jnp.float32)], axis=0),     # rows H:2H <- h_b
        H)                                                               # (2H, 8H)

    # Lane-dense classifier: pad the 4-wide output to 128 lanes.
    wlin_p = jnp.zeros((2 * H, OUT_PAD), jnp.float32).at[:, :C].set(wlin.T.astype(jnp.float32))
    blin_p = jnp.zeros((1, OUT_PAD), jnp.float32).at[:, :C].set(blin.astype(jnp.float32))

    return (tab_stack.astype(jnp.bfloat16),
            whh_blk.astype(jnp.bfloat16),
            wlin_p.astype(jnp.bfloat16),
            blin_p)                                                      # (1, 128) f32


# --------------------------------- wrapper ---------------------------------
def text_lstm_forward(input_ids, prepared, num_classes=NUM_CLASSES):
    tab_stack, whh_blk, wlin_p, blin_p = prepared
    B, T = input_ids.shape
    Bp = max(8, -(-B // 8) * 8)                  # pad batch to a full sublane tile

    ids = input_ids.astype(jnp.int32)
    if Bp > B:
        ids = jnp.concatenate([ids, jnp.zeros((Bp - B, T), jnp.int32)], axis=0)
    ids_tm = jnp.transpose(ids)                                   # (T, Bp) time-major
    idf = ids_tm.reshape(T * Bp, 1)                               # fwd ids, row = t*Bp + b
    idr = ids_tm[::-1, :].reshape(T * Bp, 1) + V_PAD              # rev ids -> bwd half of the table

    vmem = pl.BlockSpec(memory_space=pltpu.MemorySpace.VMEM)
    out = pl.pallas_call(
        bilstm_kernel,
        out_shape=jax.ShapeDtypeStruct((Bp, OUT_PAD), jnp.float32),
        in_specs=[vmem] * 6,            # whole arrays resident in VMEM, no grid/tiling
        out_specs=vmem,
    )(idf, idr, tab_stack, whh_blk, wlin_p, blin_p)
    return out[:B, :num_classes]


# --------------------------- deterministic params ---------------------------
def init_params(key):
    k = jax.random.split(key, 11)
    s = 1.0 / math.sqrt(HIDDEN)

    def u(kk, shape, scale):
        return jax.random.uniform(kk, shape, jnp.float32, -scale, scale)

    emb_table = jax.random.normal(k[0], (VOCAB, EMB), jnp.float32)
    wih_f = u(k[1], (4 * HIDDEN, EMB), s)
    whh_f = u(k[2], (4 * HIDDEN, HIDDEN), s)
    bih_f = u(k[3], (4 * HIDDEN,), s)
    bhh_f = u(k[4], (4 * HIDDEN,), s)
    wih_b = u(k[5], (4 * HIDDEN, EMB), s)
    whh_b = u(k[6], (4 * HIDDEN, HIDDEN), s)
    bih_b = u(k[7], (4 * HIDDEN,), s)
    bhh_b = u(k[8], (4 * HIDDEN,), s)
    slin = 1.0 / math.sqrt(2 * HIDDEN)
    wlin = u(k[9], (NUM_CLASSES, 2 * HIDDEN), slin)
    blin = u(k[10], (NUM_CLASSES,), slin)
    return (emb_table, wih_f, whh_f, bih_f, bhh_f,
            wih_b, whh_b, bih_b, bhh_b, wlin, blin)


# ----------------------------- pure-JAX reference ---------------------------
def reference_forward(input_ids, params):
    (emb_table, wih_f, whh_f, bih_f, bhh_f,
     wih_b, whh_b, bih_b, bhh_b, wlin, blin) = params
    x = jnp.take(emb_table, input_ids, axis=0)   # (B, T, E)
    B, T, _ = x.shape
    H = HIDDEN

    def run_dir(xseq, wih, whh, bih, bhh):
        def cell(carry, xt):
            h, c = carry
            g = xt @ wih.T + bih + h @ whh.T + bhh
            i = jax.nn.sigmoid(g[:, :H])
            f = jax.nn.sigmoid(g[:, H:2 * H])
            gg = jnp.tanh(g[:, 2 * H:3 * H])
            o = jax.nn.sigmoid(g[:, 3 * H:])
            c = f * c + i * gg
            h = o * jnp.tanh(c)
            return (h, c), h

        init = (jnp.zeros((B, H), jnp.float32), jnp.zeros((B, H), jnp.float32))
        (h, _), _ = lax.scan(cell, init, jnp.transpose(xseq, (1, 0, 2)))
        return h

    h_f = run_dir(x, wih_f, whh_f, bih_f, bhh_f)
    h_b = run_dir(x[:, ::-1, :], wih_b, whh_b, bih_b, bhh_b)
    feat = jnp.concatenate([h_f, h_b], axis=1)
    return feat @ wlin.T + blin


if __name__ == "__main__":
    key = jax.random.PRNGKey(0)
    pk, ik = jax.random.split(key)
    params = init_params(pk)
    input_ids = jax.random.randint(ik, (BATCH, SEQ), 0, VOCAB, dtype=jnp.int32)

    prepared = prepare_params(params)            # one-time weight folding
    out = text_lstm_forward(input_ids, prepared)
    out = jax.block_until_ready(out)

    ref = reference_forward(input_ids, params)
    assert out.shape == (BATCH, NUM_CLASSES)
    # bf16 matmul operands (f32 accumulation/state) -> relaxed tolerance vs f32 reference
    assert jnp.allclose(out, ref, atol=2e-2, rtol=2e-2), (out, ref, jnp.max(jnp.abs(out - ref)))
    print("KERNEL_OK")
</pallas_src>

<mosaic_0001>
module attributes {stable_mosaic.version = 11 : i64} {
  func.func @bilstm_kernel(%arg0: memref<64x1xi32, #tpu.memory_space<vmem>>, %arg1: memref<64x1xi32, #tpu.memory_space<vmem>>, %arg2: memref<128x256xbf16, #tpu.memory_space<vmem>>, %arg3: memref<64x256xbf16, #tpu.memory_space<vmem>>, %arg4: memref<64x128xbf16, #tpu.memory_space<vmem>>, %arg5: memref<1x128xf32, #tpu.memory_space<vmem>>, %arg6: memref<8x128xf32, #tpu.memory_space<vmem>>) attributes {dimension_semantics = [], scalar_prefetch = 0 : i64, scratch_operands = 0 : i64, tpu.core_type = #tpu.core_type<tc>} {
    %c0 = arith.constant 0 : index
    %c0_0 = arith.constant 0 : index
    %0 = vector.load %arg0[%c0, %c0_0] : memref<64x1xi32, #tpu.memory_space<vmem>>, vector<64x1xi32>
    %c0_1 = arith.constant 0 : index
    %c0_2 = arith.constant 0 : index
    %1 = vector.load %arg1[%c0_1, %c0_2] : memref<64x1xi32, #tpu.memory_space<vmem>>, vector<64x1xi32>
    %2 = tpu.iota {dimensions = array<i32: 1>} : vector<64x128xi32>
    %3 = vector.broadcast %0 : vector<64x1xi32> to vector<64x128xi32>
    %4 = arith.cmpi eq, %2, %3 : vector<64x128xi32>
    %5 = vector.broadcast %1 : vector<64x1xi32> to vector<64x128xi32>
    %6 = arith.cmpi eq, %2, %5 : vector<64x128xi32>
    %7 = arith.ori %4, %6 : vector<64x128xi1>
    %cst = arith.constant 1.000000e+00 : f32
    %cst_3 = arith.constant 0.000000e+00 : f32
    %8 = vector.broadcast %cst : f32 to vector<64x128xf32>
    %9 = vector.broadcast %cst_3 : f32 to vector<64x128xf32>
    %10 = arith.select %7, %8, %9 : vector<64x128xi1>, vector<64x128xf32>
    %11 = arith.truncf %10 : vector<64x128xf32> to vector<64x128xbf16>
    %c0_4 = arith.constant 0 : index
    %c0_5 = arith.constant 0 : index
    %12 = vector.load %arg2[%c0_4, %c0_5] : memref<128x256xbf16, #tpu.memory_space<vmem>>, vector<128x256xbf16>
    %cst_6 = arith.constant dense<0.000000e+00> : vector<64x256xf32>
    %13 = tpu.matmul %11, %12, %cst_6 {dimension_numbers = #tpu.dot_dimension_numbers<[1], [0], [0], [1], [0, 0, 1, 1], [], []>} : vector<64x128xbf16>, vector<128x256xbf16>, vector<64x256xf32> -> vector<64x256xf32>
    %c0_7 = arith.constant 0 : index
    %c0_8 = arith.constant 0 : index
    %14 = vector.load %arg3[%c0_7, %c0_8] : memref<64x256xbf16, #tpu.memory_space<vmem>>, vector<64x256xbf16>
    %cst_9 = arith.constant 0.000000e+00 : f32
    %15 = vector.broadcast %cst_9 : f32 to vector<8x64xf32>
    %cst_10 = arith.constant 0.000000e+00 : f32
    %16 = vector.broadcast %cst_10 : f32 to vector<8x64xf32>
    %17 = vector.extract_strided_slice %13 {offsets = [0, 0], sizes = [8, 256], strides = [1, 1]} : vector<64x256xf32> to vector<8x256xf32>
    %18 = arith.truncf %15 : vector<8x64xf32> to vector<8x64xbf16>
    %cst_11 = arith.constant dense<0.000000e+00> : vector<8x256xf32>
    %19 = tpu.matmul %18, %14, %cst_11 {dimension_numbers = #tpu.dot_dimension_numbers<[1], [0], [0], [1], [0, 0, 1, 1], [], []>} : vector<8x64xbf16>, vector<64x256xbf16>, vector<8x256xf32> -> vector<8x256xf32>
    %20 = arith.addf %17, %19 : vector<8x256xf32>
    %21 = vector.extract_strided_slice %20 {offsets = [0, 0], sizes = [8, 192], strides = [1, 1]} : vector<8x256xf32> to vector<8x192xf32>
    %cst_12 = arith.constant 5.000000e-01 : f32
    %22 = vector.broadcast %cst_12 : f32 to vector<8x192xf32>
    %23 = arith.mulf %22, %21 : vector<8x192xf32>
    %24 = math.tanh %23 : vector<8x192xf32>
    %cst_13 = arith.constant 1.000000e+00 : f32
    %25 = vector.broadcast %cst_13 : f32 to vector<8x192xf32>
    %26 = arith.addf %24, %25 : vector<8x192xf32>
    %cst_14 = arith.constant 5.000000e-01 : f32
    %27 = vector.broadcast %cst_14 : f32 to vector<8x192xf32>
    %28 = arith.mulf %27, %26 : vector<8x192xf32>
    %29 = vector.extract_strided_slice %28 {offsets = [0, 0], sizes = [8, 64], strides = [1, 1]} : vector<8x192xf32> to vector<8x64xf32>
    %30 = vector.extract_strided_slice %28 {offsets = [0, 64], sizes = [8, 64], strides = [1, 1]} : vector<8x192xf32> to vector<8x64xf32>
    %31 = vector.extract_strided_slice %28 {offsets = [0, 128], sizes = [8, 64], strides = [1, 1]} : vector<8x192xf32> to vector<8x64xf32>
    %32 = vector.extract_strided_slice %20 {offsets = [0, 192], sizes = [8, 64], strides = [1, 1]} : vector<8x256xf32> to vector<8x64xf32>
    %33 = math.tanh %32 : vector<8x64xf32>
    %34 = arith.mulf %30, %16 : vector<8x64xf32>
    %35 = arith.mulf %29, %33 : vector<8x64xf32>
    %36 = arith.addf %34, %35 : vector<8x64xf32>
    %37 = math.tanh %36 : vector<8x64xf32>
    %38 = arith.mulf %31, %37 : vector<8x64xf32>
    %39 = vector.extract_strided_slice %13 {offsets = [8, 0], sizes = [8, 256], strides = [1, 1]} : vector<64x256xf32> to vector<8x256xf32>
    %40 = arith.truncf %38 : vector<8x64xf32> to vector<8x64xbf16>
    %cst_15 = arith.constant dense<0.000000e+00> : vector<8x256xf32>
    %41 = tpu.matmul %40, %14, %cst_15 {dimension_numbers = #tpu.dot_dimension_numbers<[1], [0], [0], [1], [0, 0, 1, 1], [], []>} : vector<8x64xbf16>, vector<64x256xbf16>, vector<8x256xf32> -> vector<8x256xf32>
    %42 = arith.addf %39, %41 : vector<8x256xf32>
    %43 = vector.extract_strided_slice %42 {offsets = [0, 0], sizes = [8, 192], strides = [1, 1]} : vector<8x256xf32> to vector<8x192xf32>
    %cst_16 = arith.constant 5.000000e-01 : f32
    %44 = vector.broadcast %cst_16 : f32 to vector<8x192xf32>
    %45 = arith.mulf %44, %43 : vector<8x192xf32>
    %46 = math.tanh %45 : vector<8x192xf32>
    %cst_17 = arith.constant 1.000000e+00 : f32
    %47 = vector.broadcast %cst_17 : f32 to vector<8x192xf32>
    %48 = arith.addf %46, %47 : vector<8x192xf32>
    %cst_18 = arith.constant 5.000000e-01 : f32
    %49 = vector.broadcast %cst_18 : f32 to vector<8x192xf32>
    %50 = arith.mulf %49, %48 : vector<8x192xf32>
    %51 = vector.extract_strided_slice %50 {offsets = [0, 0], sizes = [8, 64], strides = [1, 1]} : vector<8x192xf32> to vector<8x64xf32>
    %52 = vector.extract_strided_slice %50 {offsets = [0, 64], sizes = [8, 64], strides = [1, 1]} : vector<8x192xf32> to vector<8x64xf32>
    %53 = vector.extract_strided_slice %50 {offsets = [0, 128], sizes = [8, 64], strides = [1, 1]} : vector<8x192xf32> to vector<8x64xf32>
    %54 = vector.extract_strided_slice %42 {offsets = [0, 192], sizes = [8, 64], strides = [1, 1]} : vector<8x256xf32> to vector<8x64xf32>
    %55 = math.tanh %54 : vector<8x64xf32>
    %56 = arith.mulf %52, %36 : vector<8x64xf32>
    %57 = arith.mulf %51, %55 : vector<8x64xf32>
    %58 = arith.addf %56, %57 : vector<8x64xf32>
    %59 = math.tanh %58 : vector<8x64xf32>
    %60 = arith.mulf %53, %59 : vector<8x64xf32>
    %61 = vector.extract_strided_slice %13 {offsets = [16, 0], sizes = [8, 256], strides = [1, 1]} : vector<64x256xf32> to vector<8x256xf32>
    %62 = arith.truncf %60 : vector<8x64xf32> to vector<8x64xbf16>
    %cst_19 = arith.constant dense<0.000000e+00> : vector<8x256xf32>
    %63 = tpu.matmul %62, %14, %cst_19 {dimension_numbers = #tpu.dot_dimension_numbers<[1], [0], [0], [1], [0, 0, 1, 1], [], []>} : vector<8x64xbf16>, vector<64x256xbf16>, vector<8x256xf32> -> vector<8x256xf32>
    %64 = arith.addf %61, %63 : vector<8x256xf32>
    %65 = vector.extract_strided_slice %64 {offsets = [0, 0], sizes = [8, 192], strides = [1, 1]} : vector<8x256xf32> to vector<8x192xf32>
    %cst_20 = arith.constant 5.000000e-01 : f32
    %66 = vector.broadcast %cst_20 : f32 to vector<8x192xf32>
    %67 = arith.mulf %66, %65 : vector<8x192xf32>
    %68 = math.tanh %67 : vector<8x192xf32>
    %cst_21 = arith.constant 1.000000e+00 : f32
    %69 = vector.broadcast %cst_21 : f32 to vector<8x192xf32>
    %70 = arith.addf %68, %69 : vector<8x192xf32>
    %cst_22 = arith.constant 5.000000e-01 : f32
    %71 = vector.broadcast %cst_22 : f32 to vector<8x192xf32>
    %72 = arith.mulf %71, %70 : vector<8x192xf32>
    %73 = vector.extract_strided_slice %72 {offsets = [0, 0], sizes = [8, 64], strides = [1, 1]} : vector<8x192xf32> to vector<8x64xf32>
    %74 = vector.extract_strided_slice %72 {offsets = [0, 64], sizes = [8, 64], strides = [1, 1]} : vector<8x192xf32> to vector<8x64xf32>
    %75 = vector.extract_strided_slice %72 {offsets = [0, 128], sizes = [8, 64], strides = [1, 1]} : vector<8x192xf32> to vector<8x64xf32>
    %76 = vector.extract_strided_slice %64 {offsets = [0, 192], sizes = [8, 64], strides = [1, 1]} : vector<8x256xf32> to vector<8x64xf32>
    %77 = math.tanh %76 : vector<8x64xf32>
    %78 = arith.mulf %74, %58 : vector<8x64xf32>
    %79 = arith.mulf %73, %77 : vector<8x64xf32>
    %80 = arith.addf %78, %79 : vector<8x64xf32>
    %81 = math.tanh %80 : vector<8x64xf32>
    %82 = arith.mulf %75, %81 : vector<8x64xf32>
    %83 = vector.extract_strided_slice %13 {offsets = [24, 0], sizes = [8, 256], strides = [1, 1]} : vector<64x256xf32> to vector<8x256xf32>
    %84 = arith.truncf %82 : vector<8x64xf32> to vector<8x64xbf16>
    %cst_23 = arith.constant dense<0.000000e+00> : vector<8x256xf32>
    %85 = tpu.matmul %84, %14, %cst_23 {dimension_numbers = #tpu.dot_dimension_numbers<[1], [0], [0], [1], [0, 0, 1, 1], [], []>} : vector<8x64xbf16>, vector<64x256xbf16>, vector<8x256xf32> -> vector<8x256xf32>
    %86 = arith.addf %83, %85 : vector<8x256xf32>
    %87 = vector.extract_strided_slice %86 {offsets = [0, 0], sizes = [8, 192], strides = [1, 1]} : vector<8x256xf32> to vector<8x192xf32>
    %cst_24 = arith.constant 5.000000e-01 : f32
    %88 = vector.broadcast %cst_24 : f32 to vector<8x192xf32>
    %89 = arith.mulf %88, %87 : vector<8x192xf32>
    %90 = math.tanh %89 : vector<8x192xf32>
    %cst_25 = arith.constant 1.000000e+00 : f32
    %91 = vector.broadcast %cst_25 : f32 to vector<8x192xf32>
    %92 = arith.addf %90, %91 : vector<8x192xf32>
    %cst_26 = arith.constant 5.000000e-01 : f32
    %93 = vector.broadcast %cst_26 : f32 to vector<8x192xf32>
    %94 = arith.mulf %93, %92 : vector<8x192xf32>
    %95 = vector.extract_strided_slice %94 {offsets = [0, 0], sizes = [8, 64], strides = [1, 1]} : vector<8x192xf32> to vector<8x64xf32>
    %96 = vector.extract_strided_slice %94 {offsets = [0, 64], sizes = [8, 64], strides = [1, 1]} : vector<8x192xf32> to vector<8x64xf32>
    %97 = vector.extract_strided_slice %94 {offsets = [0, 128], sizes = [8, 64], strides = [1, 1]} : vector<8x192xf32> to vector<8x64xf32>
    %98 = vector.extract_strided_slice %86 {offsets = [0, 192], sizes = [8, 64], strides = [1, 1]} : vector<8x256xf32> to vector<8x64xf32>
    %99 = math.tanh %98 : vector<8x64xf32>
    %100 = arith.mulf %96, %80 : vector<8x64xf32>
    %101 = arith.mulf %95, %99 : vector<8x64xf32>
    %102 = arith.addf %100, %101 : vector<8x64xf32>
    %103 = math.tanh %102 : vector<8x64xf32>
    %104 = arith.mulf %97, %103 : vector<8x64xf32>
    %105 = vector.extract_strided_slice %13 {offsets = [32, 0], sizes = [8, 256], strides = [1, 1]} : vector<64x256xf32> to vector<8x256xf32>
    %106 = arith.truncf %104 : vector<8x64xf32> to vector<8x64xbf16>
    %cst_27 = arith.constant dense<0.000000e+00> : vector<8x256xf32>
    %107 = tpu.matmul %106, %14, %cst_27 {dimension_numbers = #tpu.dot_dimension_numbers<[1], [0], [0], [1], [0, 0, 1, 1], [], []>} : vector<8x64xbf16>, vector<64x256xbf16>, vector<8x256xf32> -> vector<8x256xf32>
    %108 = arith.addf %105, %107 : vector<8x256xf32>
    %109 = vector.extract_strided_slice %108 {offsets = [0, 0], sizes = [8, 192], strides = [1, 1]} : vector<8x256xf32> to vector<8x192xf32>
    %cst_28 = arith.constant 5.000000e-01 : f32
    %110 = vector.broadcast %cst_28 : f32 to vector<8x192xf32>
    %111 = arith.mulf %110, %109 : vector<8x192xf32>
    %112 = math.tanh %111 : vector<8x192xf32>
    %cst_29 = arith.constant 1.000000e+00 : f32
    %113 = vector.broadcast %cst_29 : f32 to vector<8x192xf32>
    %114 = arith.addf %112, %113 : vector<8x192xf32>
    %cst_30 = arith.constant 5.000000e-01 : f32
    %115 = vector.broadcast %cst_30 : f32 to vector<8x192xf32>
    %116 = arith.mulf %115, %114 : vector<8x192xf32>
    %117 = vector.extract_strided_slice %116 {offsets = [0, 0], sizes = [8, 64], strides = [1, 1]} : vector<8x192xf32> to vector<8x64xf32>
    %118 = vector.extract_strided_slice %116 {offsets = [0, 64], sizes = [8, 64], strides = [1, 1]} : vector<8x192xf32> to vector<8x64xf32>
    %119 = vector.extract_strided_slice %116 {offsets = [0, 128], sizes = [8, 64], strides = [1, 1]} : vector<8x192xf32> to vector<8x64xf32>
    %120 = vector.extract_strided_slice %108 {offsets = [0, 192], sizes = [8, 64], strides = [1, 1]} : vector<8x256xf32> to vector<8x64xf32>
    %121 = math.tanh %120 : vector<8x64xf32>
    %122 = arith.mulf %118, %102 : vector<8x64xf32>
    %123 = arith.mulf %117, %121 : vector<8x64xf32>
    %124 = arith.addf %122, %123 : vector<8x64xf32>
    %125 = math.tanh %124 : vector<8x64xf32>
    %126 = arith.mulf %119, %125 : vector<8x64xf32>
    %127 = vector.extract_strided_slice %13 {offsets = [40, 0], sizes = [8, 256], strides = [1, 1]} : vector<64x256xf32> to vector<8x256xf32>
    %128 = arith.truncf %126 : vector<8x64xf32> to vector<8x64xbf16>
    %cst_31 = arith.constant dense<0.000000e+00> : vector<8x256xf32>
    %129 = tpu.matmul %128, %14, %cst_31 {dimension_numbers = #tpu.dot_dimension_numbers<[1], [0], [0], [1], [0, 0, 1, 1], [], []>} : vector<8x64xbf16>, vector<64x256xbf16>, vector<8x256xf32> -> vector<8x256xf32>
    %130 = arith.addf %127, %129 : vector<8x256xf32>
    %131 = vector.extract_strided_slice %130 {offsets = [0, 0], sizes = [8, 192], strides = [1, 1]} : vector<8x256xf32> to vector<8x192xf32>
    %cst_32 = arith.constant 5.000000e-01 : f32
    %132 = vector.broadcast %cst_32 : f32 to vector<8x192xf32>
    %133 = arith.mulf %132, %131 : vector<8x192xf32>
    %134 = math.tanh %133 : vector<8x192xf32>
    %cst_33 = arith.constant 1.000000e+00 : f32
    %135 = vector.broadcast %cst_33 : f32 to vector<8x192xf32>
    %136 = arith.addf %134, %135 : vector<8x192xf32>
    %cst_34 = arith.constant 5.000000e-01 : f32
    %137 = vector.broadcast %cst_34 : f32 to vector<8x192xf32>
    %138 = arith.mulf %137, %136 : vector<8x192xf32>
    %139 = vector.extract_strided_slice %138 {offsets = [0, 0], sizes = [8, 64], strides = [1, 1]} : vector<8x192xf32> to vector<8x64xf32>
    %140 = vector.extract_strided_slice %138 {offsets = [0, 64], sizes = [8, 64], strides = [1, 1]} : vector<8x192xf32> to vector<8x64xf32>
    %141 = vector.extract_strided_slice %138 {offsets = [0, 128], sizes = [8, 64], strides = [1, 1]} : vector<8x192xf32> to vector<8x64xf32>
    %142 = vector.extract_strided_slice %130 {offsets = [0, 192], sizes = [8, 64], strides = [1, 1]} : vector<8x256xf32> to vector<8x64xf32>
    %143 = math.tanh %142 : vector<8x64xf32>
    %144 = arith.mulf %140, %124 : vector<8x64xf32>
    %145 = arith.mulf %139, %143 : vector<8x64xf32>
    %146 = arith.addf %144, %145 : vector<8x64xf32>
    %147 = math.tanh %146 : vector<8x64xf32>
    %148 = arith.mulf %141, %147 : vector<8x64xf32>
    %149 = vector.extract_strided_slice %13 {offsets = [48, 0], sizes = [8, 256], strides = [1, 1]} : vector<64x256xf32> to vector<8x256xf32>
    %150 = arith.truncf %148 : vector<8x64xf32> to vector<8x64xbf16>
    %cst_35 = arith.constant dense<0.000000e+00> : vector<8x256xf32>
    %151 = tpu.matmul %150, %14, %cst_35 {dimension_numbers = #tpu.dot_dimension_numbers<[1], [0], [0], [1], [0, 0, 1, 1], [], []>} : vector<8x64xbf16>, vector<64x256xbf16>, vector<8x256xf32> -> vector<8x256xf32>
    %152 = arith.addf %149, %151 : vector<8x256xf32>
    %153 = vector.extract_strided_slice %152 {offsets = [0, 0], sizes = [8, 192], strides = [1, 1]} : vector<8x256xf32> to vector<8x192xf32>
    %cst_36 = arith.constant 5.000000e-01 : f32
    %154 = vector.broadcast %cst_36 : f32 to vector<8x192xf32>
    %155 = arith.mulf %154, %153 : vector<8x192xf32>
    %156 = math.tanh %155 : vector<8x192xf32>
    %cst_37 = arith.constant 1.000000e+00 : f32
    %157 = vector.broadcast %cst_37 : f32 to vector<8x192xf32>
    %158 = arith.addf %156, %157 : vector<8x192xf32>
    %cst_38 = arith.constant 5.000000e-01 : f32
    %159 = vector.broadcast %cst_38 : f32 to vector<8x192xf32>
    %160 = arith.mulf %159, %158 : vector<8x192xf32>
    %161 = vector.extract_strided_slice %160 {offsets = [0, 0], sizes = [8, 64], strides = [1, 1]} : vector<8x192xf32> to vector<8x64xf32>
    %162 = vector.extract_strided_slice %160 {offsets = [0, 64], sizes = [8, 64], strides = [1, 1]} : vector<8x192xf32> to vector<8x64xf32>
    %163 = vector.extract_strided_slice %160 {offsets = [0, 128], sizes = [8, 64], strides = [1, 1]} : vector<8x192xf32> to vector<8x64xf32>
    %164 = vector.extract_strided_slice %152 {offsets = [0, 192], sizes = [8, 64], strides = [1, 1]} : vector<8x256xf32> to vector<8x64xf32>
    %165 = math.tanh %164 : vector<8x64xf32>
    %166 = arith.mulf %162, %146 : vector<8x64xf32>
    %167 = arith.mulf %161, %165 : vector<8x64xf32>
    %168 = arith.addf %166, %167 : vector<8x64xf32>
    %169 = math.tanh %168 : vector<8x64xf32>
    %170 = arith.mulf %163, %169 : vector<8x64xf32>
    %171 = vector.extract_strided_slice %13 {offsets = [56, 0], sizes = [8, 256], strides = [1, 1]} : vector<64x256xf32> to vector<8x256xf32>
    %172 = arith.truncf %170 : vector<8x64xf32> to vector<8x64xbf16>
    %cst_39 = arith.constant dense<0.000000e+00> : vector<8x256xf32>
    %173 = tpu.matmul %172, %14, %cst_39 {dimension_numbers = #tpu.dot_dimension_numbers<[1], [0], [0], [1], [0, 0, 1, 1], [], []>} : vector<8x64xbf16>, vector<64x256xbf16>, vector<8x256xf32> -> vector<8x256xf32>
    %174 = arith.addf %171, %173 : vector<8x256xf32>
    %175 = vector.extract_strided_slice %174 {offsets = [0, 0], sizes = [8, 192], strides = [1, 1]} : vector<8x256xf32> to vector<8x192xf32>
    %cst_40 = arith.constant 5.000000e-01 : f32
    %176 = vector.broadcast %cst_40 : f32 to vector<8x192xf32>
    %177 = arith.mulf %176, %175 : vector<8x192xf32>
    %178 = math.tanh %177 : vector<8x192xf32>
    %cst_41 = arith.constant 1.000000e+00 : f32
    %179 = vector.broadcast %cst_41 : f32 to vector<8x192xf32>
    %180 = arith.addf %178, %179 : vector<8x192xf32>
    %cst_42 = arith.constant 5.000000e-01 : f32
    %181 = vector.broadcast %cst_42 : f32 to vector<8x192xf32>
    %182 = arith.mulf %181, %180 : vector<8x192xf32>
    %183 = vector.extract_strided_slice %182 {offsets = [0, 0], sizes = [8, 64], strides = [1, 1]} : vector<8x192xf32> to vector<8x64xf32>
    %184 = vector.extract_strided_slice %182 {offsets = [0, 64], sizes = [8, 64], strides = [1, 1]} : vector<8x192xf32> to vector<8x64xf32>
    %185 = vector.extract_strided_slice %182 {offsets = [0, 128], sizes = [8, 64], strides = [1, 1]} : vector<8x192xf32> to vector<8x64xf32>
    %186 = vector.extract_strided_slice %174 {offsets = [0, 192], sizes = [8, 64], strides = [1, 1]} : vector<8x256xf32> to vector<8x64xf32>
    %187 = math.tanh %186 : vector<8x64xf32>
    %188 = arith.mulf %184, %168 : vector<8x64xf32>
    %189 = arith.mulf %183, %187 : vector<8x64xf32>
    %190 = arith.addf %188, %189 : vector<8x64xf32>
    %191 = math.tanh %190 : vector<8x64xf32>
    %192 = arith.mulf %185, %191 : vector<8x64xf32>
    %193 = arith.truncf %192 : vector<8x64xf32> to vector<8x64xbf16>
    %c0_43 = arith.constant 0 : index
    %c0_44 = arith.constant 0 : index
    %194 = vector.load %arg4[%c0_43, %c0_44] : memref<64x128xbf16, #tpu.memory_space<vmem>>, vector<64x128xbf16>
    %cst_45 = arith.constant dense<0.000000e+00> : vector<8x128xf32>
    %195 = tpu.matmul %193, %194, %cst_45 {dimension_numbers = #tpu.dot_dimension_numbers<[1], [0], [0], [1], [0, 0, 1, 1], [], []>} : vector<8x64xbf16>, vector<64x128xbf16>, vector<8x128xf32> -> vector<8x128xf32>
    %c0_46 = arith.constant 0 : index
    %c0_47 = arith.constant 0 : index
    %196 = vector.load %arg5[%c0_46, %c0_47] : memref<1x128xf32, #tpu.memory_space<vmem>>, vector<1x128xf32>
    %197 = vector.broadcast %196 : vector<1x128xf32> to vector<8x128xf32>
    %198 = arith.addf %195, %197 : vector<8x128xf32>
    %c0_48 = arith.constant 0 : index
    %c0_49 = arith.constant 0 : index
    %199 = vector.load %arg6[%c0_48, %c0_49] : memref<8x128xf32, #tpu.memory_space<vmem>>, vector<8x128xf32>
    tpu.vector_store %arg6[%c0_48, %c0_49], %198 {strides = array<i32>} : memref<8x128xf32, #tpu.memory_space<vmem>>, vector<8x128xf32>,
    return
  }
}

</mosaic_0001>

<bundles_post_ra>
// kernel: tpu_custom_call.1
= control target key start
LH: loop header
LB: loop body
LE: loop exit
PB: predicated region body
PF: predicated region fallthrough
CT: control target
= control target key end

     0   :  { %11 = vsyncpa [#allocation3], 0  ;;  %s1671_s0 = inlined_call_operand.vmem [shape: s32[64,1], index: 0, kind: input, shape index: {}]   ;;  %s1672_s1 = inlined_call_operand.vmem [shape: s32[64,1], index: 1, kind: input, shape index: {}]   ;;  %s1673_s2 = inlined_call_operand.vmem [shape: bf16[128,256], index: 2, kind: input, shape index: {}]   ;;  %s1674_s3 = inlined_call_operand.hbm [shape: bf16[64,256], index: 3, kind: input, shape index: {}]   ;;  %s1675_s4 = inlined_call_operand.hbm [shape: bf16[64,128], index: 4, kind: input, shape index: {}]   ;;  %s1676_s5 = inlined_call_operand.vmem [shape: f32[1,128], index: 5, kind: input, shape index: {}]   ;;  %s1677_s6 = inlined_call_operand.hbm [shape: f32[8,128], index: 6, kind: output, shape index: {}]  }
   0x1   :  { %12 = vsyncpa [#allocation6], 0 }
   0x2   :  { %13 = vsyncpa [#allocation4], 0  ;;  %s1307_s21 = smov [#allocation2]   ;;  %s1235_s25 = scalar_lea.hbm %s1674_s3, 1024 }
   0x3   :  { %s25_s22 = sshll.u32 %s1307_s21, 4  ;;  %p1236_p0 = scmp.ne.s32.totalorder %s1674_s3, %s1235_s25  ;;  %s26_s22 = int_to_ptr.vmem [resolvable:$true] %s25_s22 }
   0x4   :  { %p1239_p1 = scmp.lt.u32.totalorder %s1235_s25, %s1674_s3 }
   0x6   :  { %p1241_p2 = pnand %p1239_p1, %p1236_p0 }
   0x8   :  { %1244 = shalt.err (!%p1241_p2)
}
   0x9   :  { %s1245_s30 = scalar_lea.vmem %s26_s22, 1024  ;;  %p1250_p4 = scmp.lt.s32.totalorder %s26_s22, %s26_s22 }
   0xa   :  { %p1246_p3 = scmp.ne.s32.totalorder %s26_s22, %s1245_s30  ;;  %p1251_p5 = scmp.lt.s32.totalorder %s1245_s30, %s1245_s30 }
   0xc   :  { %p1252_p6 = por %p1251_p5, %p1250_p4 }
   0xe   :  { %p1253_p7 = pnand %p1252_p6, %p1246_p3 }
  0x10   :  { %1256 = shalt.err (!%p1253_p7)
}
  0x11   :  { %s1308_s7 = smov 128   ;;  %s1309_s8 = smov 8  }
  0x12   :  { %31 = dma.hbm_to_vmem [thread:$0]  %s1674_s3, 1024, %s26_s22, [#allocation3], %s1308_s7, %s1308_s7, %s1309_s8  }
  0x13   :  { %s1310_s11 = smov [#allocation5]   ;;  %s1257_s15 = scalar_lea.hbm %s1675_s4, 512 }
  0x14   :  { %s37_s12 = sshll.u32 %s1310_s11, 4  ;;  %p1258_p8 = scmp.ne.s32.totalorder %s1675_s4, %s1257_s15  ;;  %s38_s12 = int_to_ptr.vmem [resolvable:$true] %s37_s12 }
  0x15   :  { %p1261_p9 = scmp.lt.u32.totalorder %s1257_s15, %s1675_s4 }
  0x17   :  { %p1263_p10 = pnand %p1261_p9, %p1258_p8 }
  0x19   :  { %1266 = shalt.err (!%p1263_p10)
}
  0x1a   :  { %s1267_s20 = scalar_lea.vmem %s38_s12, 512  ;;  %p1272_p12 = scmp.lt.s32.totalorder %s38_s12, %s38_s12 }
  0x1b   :  { %p1268_p11 = scmp.ne.s32.totalorder %s38_s12, %s1267_s20  ;;  %p1273_p13 = scmp.lt.s32.totalorder %s1267_s20, %s1267_s20 }
  0x1d   :  { %p1274_p0 = por %p1273_p13, %p1272_p12 }
  0x1f   :  { %p1275_p1 = pnand %p1274_p0, %p1268_p11 }
  0x21   :  { %1278 = shalt.err (!%p1275_p1)
}
  0x22   :  { %s1311_s3 = smov 64   ;;  %s1312_s21 = smov 4  }
  0x23   :  { %43 = dma.hbm_to_vmem [thread:$0]  %s1675_s4, 512, %s38_s12, [#allocation6], %s1311_s3, %s1311_s3, %s1312_s21  }
  0x24   :  { %1301 = dma.done.wait [#allocation3], 1024  }
  0x25   :  { %1302 = vsyncadd [#allocation3], 4294966272 }
  0x26   :  { %1303 = dma.done.wait [#allocation6], 512  }
  0x27   :  { %1304 = vsyncadd [#allocation6], 4294966784  ;;  %v1313_v0 = vmov 0   ;;  %v61_v1 = vld [vmem:[%s1672_s1] sm:$0xff]  ;;  %v62_v3 = vld [vmem:[%s1672_s1 + $0x8] sm:$0xff]  ;;  %v69_v29 = vlaneseq  ;;  %vm372_vm7 = vcmask 523264  }
  0x28   :  { %1130 = vset.pattern.permute.xlu1 %v1313_v0  ;;  %1129 = vset.pattern.permute.xlu0 %v1313_v0  ;;  %v53_v2 = vld [vmem:[%s1671_s0] sm:$0xff]  ;;  %v54_v4 = vld [vmem:[%s1671_s0 + $0x8] sm:$0xff]  ;;  %v1134_v7 = vld [vmem:[%s1673_s2 + $0x14] ss:$8 sps:$4 sm:$0xff]   ;;  %v1314_v35 = vmov 1.0|1.0  }
  0x29   :  { %408 = vmatprep.mubr.bf16.mxu1 %v1313_v0  ;;  %283 = vmatprep.mubr.bf16.mxu0 %v1313_v0  ;;  %v1131_v5 = vld [vmem:[%s1673_s2 + $0x4] ss:$8 sps:$4 sm:$0xff]   ;;  %v1133_v6 = vld [vmem:[%s1673_s2] ss:$8 sps:$4 sm:$0xff]   ;;  %v1136_v8 = vld [vmem:[%s1673_s2 + $0x10] ss:$8 sps:$4 sm:$0xff]  }
  0x2a   :  { %104 = vperm.xlu1 %1130, %v61_v1   ;;  %72 = vperm.xlu0 %1129, %v53_v2   ;;  %v1137_v9 = vld [vmem:[%s1673_s2 + $0x24] ss:$8 sps:$4 sm:$0xff]   ;;  %v1412_v11 = vld [vmem:[#allocation2] ss:$8 sps:$4 sm:$0xff]   ;;  %v1419_v13 = vld [vmem:[#allocation2 + $0x14] ss:$8 sps:$4 sm:$0xff]  }
  0x2b   :  { %251 = vmatprep.subr.bf16.mxu0 %v1131_v5  ;;  %v1410_v10 = vld [vmem:[#allocation2 + $0x4] ss:$8 sps:$4 sm:$0xff]   ;;  %v1139_v12 = vld [vmem:[%s1673_s2 + $0x20] ss:$8 sps:$4 sm:$0xff]   ;;  %v1421_v14 = vld [vmem:[#allocation2 + $0x10] ss:$8 sps:$4 sm:$0xff]  }
  0x2c   :  { %252 = vmatpush1.bf16.msra.mxu0 %v1133_v6  ;;  %376 = vmatprep.subr.bf16.mxu1 %v1410_v10  ;;  %v1140_v15 = vld [vmem:[%s1673_s2 + $0x34] ss:$8 sps:$4 sm:$0xff]   ;;  %v1427_v16 = vld [vmem:[#allocation2 + $0x24] ss:$8 sps:$4 sm:$0xff]   ;;  %v1142_v17 = vld [vmem:[%s1673_s2 + $0x30] ss:$8 sps:$4 sm:$0xff]  }
  0x2d   :  { %253 = vmatprep.subr.bf16.mxu0 %v1134_v7  ;;  %377 = vmatpush1.bf16.msra.mxu1 %v1412_v11  ;;  %v1433_v18 = vld [vmem:[#allocation2 + $0x20] ss:$8 sps:$4 sm:$0xff]   ;;  %v1146_v19 = vld [vmem:[%s1673_s2 + $0x44] ss:$8 sps:$4 sm:$0xff]   ;;  %v1439_v20 = vld [vmem:[#allocation2 + $0x34] ss:$8 sps:$4 sm:$0xff]  }
  0x2e   :  { %107 = vperm.xlu1 %1130, %v62_v3   ;;  %75 = vperm.xlu0 %1129, %v54_v4   ;;  %v1148_v21 = vld [vmem:[%s1673_s2 + $0x40] ss:$8 sps:$4 sm:$0xff]   ;;  %v1152_v22 = vld [vmem:[%s1673_s2 + $0x54] ss:$8 sps:$4 sm:$0xff]   ;;  %v1447_v23 = vld [vmem:[#allocation2 + $0x30] ss:$8 sps:$4 sm:$0xff]  }
  0x2f   :  { %378 = vmatprep.subr.bf16.mxu1 %v1419_v13  ;;  %v1154_v24 = vld [vmem:[%s1673_s2 + $0x50] ss:$8 sps:$4 sm:$0xff]   ;;  %v1158_v25 = vld [vmem:[%s1673_s2 + $0x64] ss:$8 sps:$4 sm:$0xff]   ;;  %v1160_v26 = vld [vmem:[%s1673_s2 + $0x60] ss:$8 sps:$4 sm:$0xff]  }
  0x30   :  { %254 = vmatpush1.bf16.msra.mxu0 %v1136_v8  ;;  %v1164_v27 = vld [vmem:[%s1673_s2 + $0x74] ss:$8 sps:$4 sm:$0xff]   ;;  %v1166_v28 = vld [vmem:[%s1673_s2 + $0x70] ss:$8 sps:$4 sm:$0xff]   ;;  %v1479_v30 = vand.u32 127, %v69_v29  ;;  %s1317_s12 = smov [#allocation7]  }
  0x31   :  { %255 = vmatprep.subr.bf16.mxu0 %v1137_v9  ;;  %379 = vmatpush1.bf16.msra.mxu1 %v1421_v14  ;;  %v55_v8 = vld [vmem:[%s1671_s0 + $0x10] sm:$0xff]  ;;  %s1046_s13 = sshll.u32 %s1317_s12, 4  ;;  %s1047_s13 = int_to_ptr.vmem [resolvable:$true] %s1046_s13 }
  0x32   :  { %380 = vmatprep.subr.bf16.mxu1 %v1427_v16  ;;  %v63_v9 = vld [vmem:[%s1672_s1 + $0x10] sm:$0xff]  ;;  %p1284_p3 = scmp.lt.s32.totalorder %s1047_s13, %s1047_s13 }
  0x34   :  { %256 = vmatpush1.bf16.msra.mxu0 %v1139_v12 }
  0x35   :  { %257 = vmatprep.subr.bf16.mxu0 %v1140_v15  ;;  %381 = vmatpush1.bf16.msra.mxu1 %v1433_v18 }
  0x36   :  { %382 = vmatprep.subr.bf16.mxu1 %v1439_v20 }
  0x38   :  { %258 = vmatpush1.bf16.msra.mxu0 %v1142_v17 }
  0x39   :  { %259 = vmatprep.subr.bf16.mxu0 %v1146_v19  ;;  %383 = vmatpush1.bf16.msra.mxu1 %v1447_v23 }
  0x3a   :  { %449 = vmatprep.subr.bf16.mxu1 %v1410_v10 }
  0x3c   :  { %260 = vmatpush1.bf16.msra.mxu0 %v1148_v21  ;;  %409 = vmatmul.mubr.bf16.vlgmr.msra.gmra.mrb[0].mxu1 %v1313_v0 }
  0x3d   :  { %261 = vmatprep.subr.bf16.mxu0 %v1152_v22  ;;  %450 = vmatpush1.bf16.msra.mxu1 %v1412_v11 }
  0x3e   :  { %451 = vmatprep.subr.bf16.mxu1 %v1419_v13  ;;  %481 = vmatprep.mubr.bf16.mxu1 %v1313_v0 }
  0x40   :  { %262 = vmatpush1.bf16.msra.mxu0 %v1154_v24  ;;  %v56_v24 = vld [vmem:[%s1671_s0 + $0x18] sm:$0xff] }
  0x41   :  { %263 = vmatprep.subr.bf16.mxu0 %v1158_v25  ;;  %452 = vmatpush1.bf16.msra.mxu1 %v1421_v14  ;;  %v64_v25 = vld [vmem:[%s1672_s1 + $0x18] sm:$0xff] }
  0x42   :  { %453 = vmatprep.subr.bf16.mxu1 %v1427_v16 }
  0x44   :  { %264 = vmatpush1.bf16.msra.mxu0 %v1160_v26 }
  0x45   :  { %265 = vmatprep.subr.bf16.mxu0 %v1164_v27  ;;  %454 = vmatpush1.bf16.msra.mxu1 %v1433_v18 }
  0x46   :  { %455 = vmatprep.subr.bf16.mxu1 %v1439_v20 }
  0x48   :  { %266 = vmatpush1.bf16.msra.mxu0 %v1166_v28 }
  0x49   :  { %595 = vmatprep.subr.bf16.mxu0 %v1410_v10  ;;  %456 = vmatpush1.bf16.msra.mxu1 %v1447_v23 }
  0x4a   :  { %522 = vmatprep.subr.bf16.mxu1 %v1410_v10 }
  0xa9   :  { %v105_v31 = vpop.permute.xlu1 %104  ;;  %v73_v32 = vpop.permute.xlu0 %72 }
  0xaa   :  { %vm127_vm0 = vcmp.eq.s32.totalorder %v1479_v30, %v105_v31  ;;  %vm95_vm1 = vcmp.eq.s32.totalorder %v1479_v30, %v73_v32 }
  0xab   :  { %vm135_vm2 = vmor %vm95_vm1, %vm127_vm0 }
  0xad   :  { %v108_v33 = vpop.permute.xlu1 %107  ;;  %v76_v34 = vpop.permute.xlu0 %75 }
  0xae   :  { %vm128_vm3 = vcmp.eq.s32.totalorder %v1479_v30, %v108_v33  ;;  %vm96_vm4 = vcmp.eq.s32.totalorder %v1479_v30, %v76_v34 }
  0xaf   :  { %vm136_vm5 = vmor %vm96_vm4, %vm128_vm3 }
  0xb0   :  { %vm1072_vm6 = vmpackc.low %vm136_vm5, %vm135_vm2 }
  0xb1   :  { %1073 = vmatmul.mubr.msk.bf16.vlgmr.msra.gmra.mrb[0].mxu0 %vm1072_vm6, %v1314_v35 }
  0xb2   :  { %293 = vmatprep.mubr.bf16.mxu0 %v1313_v0  ;;  %596 = vmatpush1.bf16.msra.mxu0 %v1412_v11 }
  0xb3   :  { %597 = vmatprep.subr.bf16.mxu0 %v1419_v13 }
  0xb6   :  { %598 = vmatpush1.bf16.msra.mxu0 %v1421_v14 }
  0xb7   :  { %599 = vmatprep.subr.bf16.mxu0 %v1427_v16 }
  0xba   :  { %600 = vmatpush1.bf16.msra.mxu0 %v1433_v18 }
  0xbb   :  { %601 = vmatprep.subr.bf16.mxu0 %v1439_v20 }
  0xbe   :  { %602 = vmatpush1.bf16.msra.mxu0 %v1447_v23 }
  0xbf   :  { %741 = vmatprep.subr.bf16.mxu0 %v1410_v10 }
 0x10f   :  { %v410_v36 = vpop.f32.mrb[0].mxu1 }
 0x110   :  { %v412_v37 = vpop.f32.mrb[1].mxu1 }
 0x111   :  { %v414_v38 = vpop.f32.mrb[2].mxu1 }
 0x112   :  { %v415_v39 = vpop.f32.mrb[3].mxu1 }
 0x184   :  { %v285_v40 = vpop.f32.mrb[0].mxu0 }
 0x185   :  { %v417_v41 = vadd.f32 %v410_v36, %v285_v40  ;;  %v287_v42 = vpop.f32.mrb[1].mxu0 }
 0x186   :  { %v418_v43 = vadd.f32 %v412_v37, %v287_v42  ;;  %v289_v44 = vpop.f32.mrb[2].mxu0 }
 0x187   :  { %v291_v45 = vpop.f32.mrb[3].mxu0  ;;  %v419_v47 = vmul.f32 0.5, %v417_v41 }
 0x188   :  { %1171 = vtanh.f32 %v418_v43  ;;  %v420_v57 = vmul.f32 0.5, %v418_v43 }
 0x189   :  { %1173 = vtanh.f32 %v419_v47 }
 0x192   :  { %v1172_v46 = vpop.eup %1171 }
 0x193   :  { %430 = vrot.lane.b32.xlu0 %v1172_v46, %s1311_s3  ;;  %v1174_v48 = vpop.eup %1173 }
 0x194   :  { %v423_v49 = vadd.f32 1.0, %v1174_v48 }
 0x196   :  { %v425_v50 = vmul.f32 0.5, %v423_v49 }
 0x198   :  { %v428_v53 = vmul.f32 0.0, %v425_v50 }
 0x205   :  { %v431_v51 = vpop.permute.xlu0 %430 }
 0x206   :  { %v433_v52 = vmul.f32 %v431_v51, %v425_v50 }
 0x208   :  { %435 = vrot.lane.b32.xlu1 %v433_v52, %s1311_s3 }
 0x27a   :  { %v436_v54 = vpop.permute.xlu1 %435 }
 0x27b   :  { %v438_v55 = vadd.f32 %v436_v54, %v428_v53  ;;  %v57_v54 = vld [vmem:[%s1671_s0 + $0x20] sm:$0xff] }
 0x27d   :  { %1175 = vtanh.f32 %v438_v55 }
 0x27e   :  { %1177 = vtanh.f32 %v420_v57  ;;  %v67_v57 = vld [vmem:[%s1672_s1 + $0x30] sm:$0xff] }
 0x287   :  { %v1176_v56 = vpop.eup %1175 }
 0x288   :  { %441 = vrot.lane.b32.xlu0 %v1176_v56, %s1311_s3  ;;  %v1178_v58 = vpop.eup %1177  ;;  %v59_v56 = vld [vmem:[%s1671_s0 + $0x30] sm:$0xff] }
 0x289   :  { %v424_v59 = vadd.f32 1.0, %v1178_v58 }
 0x28b   :  { %v426_v60 = vmul.f32 0.5, %v424_v59 }
 0x2fa   :  { %v442_v61 = vpop.permute.xlu0 %441 }
 0x2fb   :  { %v444_v62 = vmul.f32 %v442_v61, %v426_v60 }
 0x2fd   :  { %v445_v63 = vpack.c.bf16 %v444_v62, %v444_v62 }
 0x2ff   :  { %1088 = vmatmul.mubr.msk.bf16.vlgmr.msra.gmra.mrb[4].mxu1 %vm372_vm7, %v445_v63 }
 0x300   :  { %523 = vmatpush1.bf16.msra.mxu1 %v1412_v11  ;;  %554 = vmatprep.mubr.bf16.mxu1 %v1313_v0 }
 0x301   :  { %524 = vmatprep.subr.bf16.mxu1 %v1419_v13 }
 0x304   :  { %525 = vmatpush1.bf16.msra.mxu1 %v1421_v14 }
 0x305   :  { %526 = vmatprep.subr.bf16.mxu1 %v1427_v16 }
 0x308   :  { %527 = vmatpush1.bf16.msra.mxu1 %v1433_v18 }
 0x309   :  { %528 = vmatprep.subr.bf16.mxu1 %v1439_v20 }
 0x30c   :  { %529 = vmatpush1.bf16.msra.mxu1 %v1447_v23 }
 0x30d   :  { %668 = vmatprep.subr.bf16.mxu1 %v1410_v10 }
 0x3d2   :  { %v483_v1 = vpop.f32.mrb[4].mxu1 }
 0x3d3   :  { %v490_v2 = vadd.f32 %v483_v1, %v289_v44  ;;  %v485_v3 = vpop.f32.mrb[5].mxu1  ;;  %v58_v1 = vld [vmem:[%s1671_s0 + $0x28] sm:$0xff] }
 0x3d4   :  { %v491_v4 = vadd.f32 %v485_v3, %v291_v45  ;;  %v487_v5 = vpop.f32.mrb[6].mxu1  ;;  %v60_v3 = vld [vmem:[%s1671_s0 + $0x38] sm:$0xff] }
 0x3d5   :  { %v488_v6 = vpop.f32.mrb[7].mxu1  ;;  %v492_v12 = vmul.f32 0.5, %v490_v2  ;;  %v66_v2 = vld [vmem:[%s1672_s1 + $0x28] sm:$0xff] }
 0x3d6   :  { %1179 = vtanh.f32 %v491_v4  ;;  %v493_v36 = vmul.f32 0.5, %v491_v4  ;;  %v68_v4 = vld [vmem:[%s1672_s1 + $0x38] sm:$0xff] }
 0x3d7   :  { %1181 = vtanh.f32 %v492_v12 }
 0x3e0   :  { %v1180_v7 = vpop.eup %1179 }
 0x3e1   :  { %503 = vrot.lane.b32.xlu1 %v1180_v7, %s1311_s3  ;;  %v1182_v15 = vpop.eup %1181 }
 0x3e2   :  { %v496_v17 = vadd.f32 1.0, %v1182_v15 }
 0x3e4   :  { %v498_v19 = vmul.f32 0.5, %v496_v17 }
 0x3e5   :  { %78 = vperm.xlu1 %1130, %v55_v8  }
 0x3e6   :  { %v501_v26 = vmul.f32 %v498_v19, %v438_v55  ;;  %v65_v55 = vld [vmem:[%s1672_s1 + $0x20] sm:$0xff] }
 0x3e9   :  { %110 = vperm.xlu1 %1130, %v63_v9  }
 0x453   :  { %v504_v21 = vpop.permute.xlu1 %503 }
 0x454   :  { %v506_v22 = vmul.f32 %v504_v21, %v498_v19 }
 0x456   :  { %508 = vrot.lane.b32.xlu0 %v506_v22, %s1311_s3 }
 0x45a   :  { %81 = vperm.xlu0 %1129, %v56_v24  }
 0x45e   :  { %113 = vperm.xlu0 %1129, %v64_v25  }
 0x464   :  { %v79_v29 = vpop.permute.xlu1 %78 }
 0x465   :  { %vm97_vm9 = vcmp.eq.s32.totalorder %v1479_v30, %v79_v29 }
 0x468   :  { %v111_v32 = vpop.permute.xlu1 %110 }
 0x469   :  { %vm129_vm8 = vcmp.eq.s32.totalorder %v1479_v30, %v111_v32 }
 0x46a   :  { %vm137_vm10 = vmor %vm97_vm9, %vm129_vm8 }
 0x4c8   :  { %v509_v27 = vpop.permute.xlu0 %508 }
 0x4c9   :  { %v1522_v28 = vadd.f32 %v509_v27, %v501_v26 }
 0x4cb   :  { %1183 = vtanh.f32 %v1522_v28 }
 0x4cc   :  { %1185 = vtanh.f32 %v493_v36 }
 0x4d5   :  { %v1184_v31 = vpop.eup %1183 }
 0x4d6   :  { %514 = vrot.lane.b32.xlu1 %v1184_v31, %s1311_s3  ;;  %v1186_v37 = vpop.eup %1185 }
 0x4d7   :  { %v497_v38 = vadd.f32 1.0, %v1186_v37 }
 0x4d9   :  { %v82_v33 = vpop.permute.xlu0 %81  ;;  %v499_v39 = vmul.f32 0.5, %v497_v38 }
 0x4da   :  { %vm98_vm11 = vcmp.eq.s32.totalorder %v1479_v30, %v82_v33 }
 0x4dd   :  { %v114_v34 = vpop.permute.xlu0 %113 }
 0x4de   :  { %vm130_vm12 = vcmp.eq.s32.totalorder %v1479_v30, %v114_v34 }
 0x4df   :  { %vm138_vm13 = vmor %vm98_vm11, %vm130_vm12 }
 0x4e0   :  { %vm1074_vm14 = vmpackc.low %vm138_vm13, %vm137_vm10 }
 0x4e1   :  { %1075 = vmatmul.mubr.msk.bf16.gmra.mrb[4].mxu0 %vm1074_vm14, %v1314_v35  ;;  %vm1316_vm14 = vmmov 0  }
 0x4e2   :  { %303 = vmatprep.mubr.bf16.mxu0 %v1313_v0 }
 0x548   :  { %v515_v40 = vpop.permute.xlu1 %514 }
 0x549   :  { %v517_v41 = vmul.f32 %v515_v40, %v499_v39 }
 0x54b   :  { %v518_v42 = vpack.c.bf16 %v517_v41, %v517_v41 }
 0x54d   :  { %1089 = vmatmul.mubr.msk.bf16.vlgmr.msra.gmra.mrb[8].mxu1 %vm372_vm7, %v518_v42 }
 0x54e   :  { %669 = vmatpush1.bf16.msra.mxu1 %v1412_v11  ;;  %700 = vmatprep.mubr.bf16.mxu1 %v1313_v0 }
 0x54f   :  { %670 = vmatprep.subr.bf16.mxu1 %v1419_v13 }
 0x552   :  { %671 = vmatpush1.bf16.msra.mxu1 %v1421_v14 }
 0x553   :  { %672 = vmatprep.subr.bf16.mxu1 %v1427_v16 }
 0x556   :  { %673 = vmatpush1.bf16.msra.mxu1 %v1433_v18 }
 0x557   :  { %674 = vmatprep.subr.bf16.mxu1 %v1439_v20 }
 0x55a   :  { %675 = vmatpush1.bf16.msra.mxu1 %v1447_v23 }
 0x55b   :  { %814 = vmatprep.subr.bf16.mxu1 %v1410_v10 }
 0x5b4   :  { %v295_v43 = vpop.f32.mrb[4].mxu0 }
 0x5b5   :  { %v297_v44 = vpop.f32.mrb[5].mxu0 }
 0x5b6   :  { %v1542_v45 = vpop.f32.mrb[6].mxu0 }
 0x5b7   :  { %v1544_v46 = vpop.f32.mrb[7].mxu0 }
 0x620   :  { %v556_v47 = vpop.f32.mrb[8].mxu1 }
 0x621   :  { %v563_v48 = vadd.f32 %v556_v47, %v295_v43  ;;  %v558_v49 = vpop.f32.mrb[9].mxu1 }
 0x622   :  { %v564_v50 = vadd.f32 %v558_v49, %v297_v44  ;;  %v560_v51 = vpop.f32.mrb[10].mxu1 }
 0x623   :  { %v561_v52 = vpop.f32.mrb[11].mxu1  ;;  %v565_v58 = vmul.f32 0.5, %v563_v48 }
 0x624   :  { %1187 = vtanh.f32 %v564_v50  ;;  %v566_v25 = vmul.f32 0.5, %v564_v50 }
 0x625   :  { %1189 = vtanh.f32 %v565_v58 }
 0x62e   :  { %v1188_v53 = vpop.eup %1187 }
 0x62f   :  { %576 = vrot.lane.b32.xlu0 %v1188_v53, %s1311_s3  ;;  %v1190_v59 = vpop.eup %1189 }
 0x630   :  { %v569_v60 = vadd.f32 1.0, %v1190_v59 }
 0x632   :  { %v571_v61 = vmul.f32 0.5, %v569_v60 }
 0x633   :  { %84 = vperm.xlu0 %1129, %v57_v54  }
 0x634   :  { %v574_v5 = vmul.f32 %v571_v61, %v1522_v28 }
 0x637   :  { %116 = vperm.xlu0 %1129, %v65_v55  }
 0x63b   :  { %90 = vperm.xlu0 %1129, %v59_v56  }
 0x63f   :  { %122 = vperm.xlu0 %1129, %v67_v57  }
 0x6a1   :  { %v577_v62 = vpop.permute.xlu0 %576 }
 0x6a2   :  { %v579_v63 = vmul.f32 %v577_v62, %v571_v61 }
 0x6a4   :  { %581 = vrot.lane.b32.xlu1 %v579_v63, %s1311_s3 }
 0x6a8   :  { %87 = vperm.xlu1 %1130, %v58_v1  }
 0x6ac   :  { %119 = vperm.xlu1 %1130, %v66_v2  }
 0x6b0   :  { %93 = vperm.xlu1 %1130, %v60_v3  }
 0x6b2   :  { %v85_v8 = vpop.permute.xlu0 %84 }
 0x6b3   :  { %vm99_vm0 = vcmp.eq.s32.totalorder %v1479_v30, %v85_v8 }
 0x6b4   :  { %125 = vperm.xlu1 %1130, %v68_v4  }
 0x6b6   :  { %v117_v9 = vpop.permute.xlu0 %116 }
 0x6b7   :  { %vm131_vm15 = vcmp.eq.s32.totalorder %v1479_v30, %v117_v9 }
 0x6b8   :  { %vm139_vm1 = vmor %vm99_vm0, %vm131_vm15 }
 0x6ba   :  { %v91_v17 = vpop.permute.xlu0 %90 }
 0x6bb   :  { %vm101_vm8 = vcmp.eq.s32.totalorder %v1479_v30, %v91_v17 }
 0x6be   :  { %v123_v21 = vpop.permute.xlu0 %122 }
 0x6bf   :  { %vm133_vm6 = vcmp.eq.s32.totalorder %v1479_v30, %v123_v21 }
 0x6c0   :  { %vm141_vm9 = vmor %vm101_vm8, %vm133_vm6 }
 0x716   :  { %v582_v6 = vpop.permute.xlu1 %581 }
 0x717   :  { %v1573_v7 = vadd.f32 %v582_v6, %v574_v5 }
 0x719   :  { %1191 = vtanh.f32 %v1573_v7 }
 0x71a   :  { %1193 = vtanh.f32 %v566_v25 }
 0x723   :  { %v1192_v12 = vpop.eup %1191 }
 0x724   :  { %587 = vrot.lane.b32.xlu0 %v1192_v12, %s1311_s3  ;;  %v1194_v26 = vpop.eup %1193 }
 0x725   :  { %v570_v27 = vadd.f32 1.0, %v1194_v26 }
 0x727   :  { %v88_v15 = vpop.permute.xlu1 %87  ;;  %v572_v28 = vmul.f32 0.5, %v570_v27 }
 0x728   :  { %vm100_vm2 = vcmp.eq.s32.totalorder %v1479_v30, %v88_v15 }
 0x72b   :  { %v120_v19 = vpop.permute.xlu1 %119 }
 0x72c   :  { %vm132_vm3 = vcmp.eq.s32.totalorder %v1479_v30, %v120_v19 }
 0x72d   :  { %vm140_vm4 = vmor %vm100_vm2, %vm132_vm3 }
 0x72e   :  { %vm1076_vm5 = vmpackc.low %vm140_vm4, %vm139_vm1 }
 0x72f   :  { %v94_v22 = vpop.permute.xlu1 %93  ;;  %1077 = vmatmul.mubr.msk.bf16.gmra.mrb[8].mxu0 %vm1076_vm5, %v1314_v35 }
 0x730   :  { %313 = vmatprep.mubr.bf16.mxu0 %v1313_v0  ;;  %vm102_vm10 = vcmp.eq.s32.totalorder %v1479_v30, %v94_v22 }
 0x733   :  { %v126_v24 = vpop.permute.xlu1 %125 }
 0x734   :  { %vm134_vm11 = vcmp.eq.s32.totalorder %v1479_v30, %v126_v24 }
 0x735   :  { %vm142_vm12 = vmor %vm102_vm10, %vm134_vm11 }
 0x736   :  { %vm1078_vm13 = vmpackc.low %vm142_vm12, %vm141_vm9 }
 0x737   :  { %1079 = vmatmul.mubr.msk.bf16.gmra.mrb[12].mxu0 %vm1078_vm13, %v1314_v35 }
 0x738   :  { %627 = vmatprep.mubr.bf16.mxu0 %v1313_v0 }
 0x796   :  { %v588_v29 = vpop.permute.xlu0 %587 }
 0x797   :  { %v590_v31 = vmul.f32 %v588_v29, %v572_v28 }
 0x799   :  { %v591_v32 = vpack.c.bf16 %v590_v31, %v590_v31 }
 0x79b   :  { %1090 = vmatmul.mubr.msk.bf16.vlgmr.msra.gmra.mrb[16].mxu0 %vm372_vm7, %v591_v32 }
 0x79c   :  { %742 = vmatpush1.bf16.msra.mxu0 %v1412_v11  ;;  %773 = vmatprep.mubr.bf16.mxu0 %v1313_v0 }
 0x79d   :  { %743 = vmatprep.subr.bf16.mxu0 %v1419_v13 }
 0x7a0   :  { %744 = vmatpush1.bf16.msra.mxu0 %v1421_v14 }
 0x7a1   :  { %745 = vmatprep.subr.bf16.mxu0 %v1427_v16 }
 0x7a4   :  { %746 = vmatpush1.bf16.msra.mxu0 %v1433_v18 }
 0x7a5   :  { %747 = vmatprep.subr.bf16.mxu0 %v1439_v20 }
 0x7a8   :  { %748 = vmatpush1.bf16.msra.mxu0 %v1447_v23 }
 0x7a9   :  { %887 = vmatprep.subr.bf16.mxu0 %v1410_v10 }
 0x802   :  { %v305_v30 = vpop.f32.mrb[8].mxu0 }
 0x803   :  { %v307_v35 = vpop.f32.mrb[9].mxu0 }
 0x804   :  { %v1599_v33 = vpop.f32.mrb[10].mxu0 }
 0x805   :  { %v1601_v34 = vpop.f32.mrb[11].mxu0 }
 0x80a   :  { %v1603_v36 = vpop.f32.mrb[12].mxu0 }
 0x80b   :  { %v1605_v37 = vpop.f32.mrb[13].mxu0 }
 0x80c   :  { %v1607_v38 = vpop.f32.mrb[14].mxu0 }
 0x80d   :  { %v1609_v39 = vpop.f32.mrb[15].mxu0 }
 0x86e   :  { %v629_v40 = vpop.f32.mrb[16].mxu0 }
 0x86f   :  { %v636_v41 = vadd.f32 %v629_v40, %v1542_v45  ;;  %v631_v42 = vpop.f32.mrb[17].mxu0 }
 0x870   :  { %v637_v10 = vadd.f32 %v631_v42, %v1544_v46  ;;  %v633_v43 = vpop.f32.mrb[18].mxu0 }
 0x871   :  { %v634_v44 = vpop.f32.mrb[19].mxu0  ;;  %v638_v48 = vmul.f32 0.5, %v636_v41 }
 0x872   :  { %1195 = vtanh.f32 %v637_v10  ;;  %v639_v56 = vmul.f32 0.5, %v637_v10 }
 0x873   :  { %1197 = vtanh.f32 %v638_v48 }
 0x87c   :  { %v1196_v47 = vpop.eup %1195 }
 0x87d   :  { %649 = vrot.lane.b32.xlu1 %v1196_v47, %s1311_s3  ;;  %v1198_v49 = vpop.eup %1197 }
 0x87e   :  { %v642_v50 = vadd.f32 1.0, %v1198_v49 }
 0x880   :  { %v644_v51 = vmul.f32 0.5, %v642_v50 }
 0x882   :  { %v647_v45 = vmul.f32 %v644_v51, %v1573_v7 }
 0x8ef   :  { %v650_v52 = vpop.permute.xlu1 %649 }
 0x8f0   :  { %v652_v53 = vmul.f32 %v650_v52, %v644_v51 }
 0x8f2   :  { %654 = vrot.lane.b32.xlu0 %v652_v53, %s1311_s3 }
 0x964   :  { %v655_v54 = vpop.permute.xlu0 %654 }
 0x965   :  { %v657_v55 = vadd.f32 %v655_v54, %v647_v45 }
 0x967   :  { %1199 = vtanh.f32 %v657_v55 }
 0x968   :  { %1201 = vtanh.f32 %v639_v56 }
 0x971   :  { %v1200_v46 = vpop.eup %1199 }
 0x972   :  { %660 = vrot.lane.b32.xlu1 %v1200_v46, %s1311_s3  ;;  %v1202_v57 = vpop.eup %1201 }
 0x973   :  { %v643_v58 = vadd.f32 1.0, %v1202_v57 }
 0x975   :  { %v645_v59 = vmul.f32 0.5, %v643_v58 }
 0x9e4   :  { %v661_v60 = vpop.permute.xlu1 %660 }
 0x9e5   :  { %v663_v61 = vmul.f32 %v661_v60, %v645_v59 }
 0x9e7   :  { %v664_v62 = vpack.c.bf16 %v663_v61, %v663_v61 }
 0x9e9   :  { %1091 = vmatmul.mubr.msk.bf16.vlgmr.msra.gmra.mrb[12].mxu1 %vm372_vm7, %v664_v62 }
 0x9ea   :  { %815 = vmatpush1.bf16.msra.mxu1 %v1412_v11  ;;  %846 = vmatprep.mubr.bf16.mxu1 %v1313_v0 }
 0x9eb   :  { %816 = vmatprep.subr.bf16.mxu1 %v1419_v13 }
 0x9ee   :  { %817 = vmatpush1.bf16.msra.mxu1 %v1421_v14 }
 0x9ef   :  { %818 = vmatprep.subr.bf16.mxu1 %v1427_v16 }
 0x9f2   :  { %819 = vmatpush1.bf16.msra.mxu1 %v1433_v18 }
 0x9f3   :  { %820 = vmatprep.subr.bf16.mxu1 %v1439_v20 }
 0x9f6   :  { %821 = vmatpush1.bf16.msra.mxu1 %v1447_v23 }
 0xabc   :  { %v702_v63 = vpop.f32.mrb[12].mxu1 }
 0xabd   :  { %v709_v1 = vadd.f32 %v702_v63, %v305_v30  ;;  %v704_v2 = vpop.f32.mrb[13].mxu1 }
 0xabe   :  { %v710_v3 = vadd.f32 %v704_v2, %v307_v35  ;;  %v706_v4 = vpop.f32.mrb[14].mxu1 }
 0xabf   :  { %v707_v5 = vpop.f32.mrb[15].mxu1  ;;  %v711_v7 = vmul.f32 0.5, %v709_v1 }
 0xac0   :  { %1203 = vtanh.f32 %v710_v3  ;;  %v712_v25 = vmul.f32 0.5, %v710_v3 }
 0xac1   :  { %1205 = vtanh.f32 %v711_v7 }
 0xaca   :  { %v1204_v6 = vpop.eup %1203 }
 0xacb   :  { %722 = vrot.lane.b32.xlu0 %v1204_v6, %s1311_s3  ;;  %v1206_v8 = vpop.eup %1205 }
 0xacc   :  { %v715_v9 = vadd.f32 1.0, %v1206_v8 }
 0xace   :  { %v717_v12 = vmul.f32 0.5, %v715_v9 }
 0xad0   :  { %v720_v19 = vmul.f32 %v717_v12, %v657_v55 }
 0xb3d   :  { %v723_v15 = vpop.permute.xlu0 %722 }
 0xb3e   :  { %v725_v17 = vmul.f32 %v723_v15, %v717_v12 }
 0xb40   :  { %727 = vrot.lane.b32.xlu1 %v725_v17, %s1311_s3 }
 0xbb2   :  { %v728_v21 = vpop.permute.xlu1 %727 }
 0xbb3   :  { %v730_v22 = vadd.f32 %v728_v21, %v720_v19 }
 0xbb5   :  { %1207 = vtanh.f32 %v730_v22 }
 0xbb6   :  { %1209 = vtanh.f32 %v712_v25 }
 0xbbf   :  { %v1208_v24 = vpop.eup %1207 }
 0xbc0   :  { %733 = vrot.lane.b32.xlu0 %v1208_v24, %s1311_s3  ;;  %v1210_v26 = vpop.eup %1209 }
 0xbc1   :  { %v716_v27 = vadd.f32 1.0, %v1210_v26 }
 0xbc3   :  { %v718_v28 = vmul.f32 0.5, %v716_v27 }
 0xc32   :  { %v734_v29 = vpop.permute.xlu0 %733 }
 0xc33   :  { %v736_v31 = vmul.f32 %v734_v29, %v718_v28 }
 0xc35   :  { %v737_v32 = vpack.c.bf16 %v736_v31, %v736_v31 }
 0xc37   :  { %1092 = vmatmul.mubr.msk.bf16.vlgmr.msra.gmra.mrb[20].mxu0 %vm372_vm7, %v737_v32  ;;  %v1167_v32 = vld [vmem:[#allocation5] sm:$0xff]  }
 0xc38   :  { %888 = vmatpush1.bf16.msra.mxu0 %v1412_v11  ;;  %919 = vmatprep.mubr.bf16.mxu0 %v1313_v0 }
 0xc39   :  { %889 = vmatprep.subr.bf16.mxu0 %v1419_v13 }
 0xc3c   :  { %890 = vmatpush1.bf16.msra.mxu0 %v1421_v14 }
 0xc3d   :  { %891 = vmatprep.subr.bf16.mxu0 %v1427_v16 }
 0xc40   :  { %892 = vmatpush1.bf16.msra.mxu0 %v1433_v18 }
 0xc41   :  { %893 = vmatprep.subr.bf16.mxu0 %v1439_v20 }
 0xc44   :  { %894 = vmatpush1.bf16.msra.mxu0 %v1447_v23 }
 0xd0a   :  { %v775_v30 = vpop.f32.mrb[20].mxu0 }
 0xd0b   :  { %v782_v35 = vadd.f32 %v775_v30, %v1599_v33  ;;  %v777_v40 = vpop.f32.mrb[21].mxu0  ;;  %v1169_v30 = vld [vmem:[#allocation5 + $0x10] sm:$0xff]  }
 0xd0c   :  { %v783_v11 = vadd.f32 %v777_v40, %v1601_v34  ;;  %v779_v41 = vpop.f32.mrb[22].mxu0 }
 0xd0d   :  { %v780_v0 = vpop.f32.mrb[23].mxu0  ;;  %v784_v14 = vmul.f32 0.5, %v782_v35 }
 0xd0e   :  { %1211 = vtanh.f32 %v783_v11  ;;  %v785_v44 = vmul.f32 0.5, %v783_v11  ;;  %v1170_v11 = vld [vmem:[#allocation5 + $0x18] sm:$0xff]  }
 0xd0f   :  { %1213 = vtanh.f32 %v784_v14 }
 0xd18   :  { %v1212_v13 = vpop.eup %1211 }
 0xd19   :  { %795 = vrot.lane.b32.xlu1 %v1212_v13, %s1311_s3  ;;  %v1214_v16 = vpop.eup %1213 }
 0xd1a   :  { %v788_v18 = vadd.f32 1.0, %v1214_v16 }
 0xd1c   :  { %v790_v42 = vmul.f32 0.5, %v788_v18 }
 0xd1e   :  { %v793_v23 = vmul.f32 %v790_v42, %v730_v22 }
 0xd8b   :  { %v796_v20 = vpop.permute.xlu1 %795 }
 0xd8c   :  { %v798_v10 = vmul.f32 %v796_v20, %v790_v42 }
 0xd8e   :  { %800 = vrot.lane.b32.xlu0 %v798_v10, %s1311_s3 }
 0xe00   :  { %v801_v33 = vpop.permute.xlu0 %800 }
 0xe01   :  { %v803_v43 = vadd.f32 %v801_v33, %v793_v23  ;;  %v1095_v23 = vld [vmem:[%s1676_s5] ss:$0 sm:$0xff] }
 0xe03   :  { %1215 = vtanh.f32 %v803_v43 }
 0xe04   :  { %1217 = vtanh.f32 %v785_v44 }
 0xe0d   :  { %v1216_v34 = vpop.eup %1215 }
 0xe0e   :  { %806 = vrot.lane.b32.xlu1 %v1216_v34, %s1311_s3  ;;  %v1218_v47 = vpop.eup %1217 }
 0xe0f   :  { %v789_v48 = vadd.f32 1.0, %v1218_v47 }
 0xe11   :  { %v791_v49 = vmul.f32 0.5, %v789_v48 }
 0xe80   :  { %v807_v50 = vpop.permute.xlu1 %806 }
 0xe81   :  { %v809_v51 = vmul.f32 %v807_v50, %v791_v49 }
 0xe83   :  { %v810_v52 = vpack.c.bf16 %v809_v51, %v809_v51 }
 0xe85   :  { %1093 = vmatmul.mubr.msk.bf16.vlgmr.msra.gmra.mrb[16].mxu1 %vm372_vm7, %v810_v52 }
 0xf58   :  { %v848_v53 = vpop.f32.mrb[16].mxu1 }
 0xf59   :  { %v855_v45 = vadd.f32 %v848_v53, %v1603_v36  ;;  %v850_v54 = vpop.f32.mrb[17].mxu1 }
 0xf5a   :  { %v856_v55 = vadd.f32 %v850_v54, %v1605_v37  ;;  %v852_v46 = vpop.f32.mrb[18].mxu1 }
 0xf5b   :  { %v853_v56 = vpop.f32.mrb[19].mxu1  ;;  %v857_v58 = vmul.f32 0.5, %v855_v45 }
 0xf5c   :  { %1219 = vtanh.f32 %v856_v55  ;;  %v858_v3 = vmul.f32 0.5, %v856_v55 }
 0xf5d   :  { %1221 = vtanh.f32 %v857_v58 }
 0xf66   :  { %v1220_v57 = vpop.eup %1219 }
 0xf67   :  { %868 = vrot.lane.b32.xlu0 %v1220_v57, %s1311_s3  ;;  %v1222_v59 = vpop.eup %1221 }
 0xf68   :  { %v861_v60 = vadd.f32 1.0, %v1222_v59 }
 0xf6a   :  { %v863_v61 = vmul.f32 0.5, %v861_v60 }
 0xf6c   :  { %v866_v1 = vmul.f32 %v863_v61, %v803_v43 }
 0xfd9   :  { %v869_v62 = vpop.permute.xlu0 %868 }
 0xfda   :  { %v871_v63 = vmul.f32 %v869_v62, %v863_v61 }
 0xfdc   :  { %873 = vrot.lane.b32.xlu1 %v871_v63, %s1311_s3 }
0x104e   :  { %v874_v36 = vpop.permute.xlu1 %873 }
0x104f   :  { %v876_v2 = vadd.f32 %v874_v36, %v866_v1 }
0x1051   :  { %1223 = vtanh.f32 %v876_v2 }
0x1052   :  { %1225 = vtanh.f32 %v858_v3 }
0x105b   :  { %v1224_v37 = vpop.eup %1223 }
0x105c   :  { %879 = vrot.lane.b32.xlu0 %v1224_v37, %s1311_s3  ;;  %v1226_v4 = vpop.eup %1225 }
0x105d   :  { %v862_v5 = vadd.f32 1.0, %v1226_v4 }
0x105f   :  { %v864_v6 = vmul.f32 0.5, %v862_v5 }
0x10ce   :  { %v880_v7 = vpop.permute.xlu0 %879 }
0x10cf   :  { %v882_v8 = vmul.f32 %v880_v7, %v864_v6 }
0x10d1   :  { %v883_v9 = vpack.c.bf16 %v882_v8, %v882_v8 }
0x10d3   :  { %1094 = vmatmul.mubr.msk.bf16.vlgmr.msra.gmra.mrb[24].mxu0 %vm372_vm7, %v883_v9 }
0x11a6   :  { %v921_v12 = vpop.f32.mrb[24].mxu0 }
0x11a7   :  { %v928_v15 = vadd.f32 %v921_v12, %v1607_v38  ;;  %v923_v17 = vpop.f32.mrb[25].mxu0  ;;  %v1315_v38 = vmov 0.0  }
0x11a8   :  { %v929_v19 = vadd.f32 %v923_v17, %v1609_v39  ;;  %v925_v21 = vpop.f32.mrb[26].mxu0  ;;  %1106 = vmatprep.subr.bf16.mxu1 %v1315_v38  ;;  %v1168_v39 = vld [vmem:[#allocation5 + $0x8] sm:$0xff]   ;;  %1114 = vmatprep.mubr.msk.bf16.mxu1 %vm1316_vm14, %v1315_v38 }
0x11a9   :  { %v926_v22 = vpop.f32.mrb[27].mxu0  ;;  %v930_v25 = vmul.f32 0.5, %v928_v15  ;;  %1107 = vmatpush3.bf16.msra.mxu1 %v1167_v32 }
0x11aa   :  { %1227 = vtanh.f32 %v929_v19  ;;  %1108 = vmatprep.subr.bf16.mxu1 %v1315_v38  ;;  %v931_v13 = vmul.f32 0.5, %v929_v19 }
0x11ab   :  { %1229 = vtanh.f32 %v930_v25 }
0x11ad   :  { %1109 = vmatpush3.bf16.msra.mxu1 %v1168_v39 }
0x11ae   :  { %1110 = vmatprep.subr.bf16.mxu1 %v1315_v38 }
0x11b1   :  { %1111 = vmatpush3.bf16.msra.mxu1 %v1169_v30 }
0x11b2   :  { %1112 = vmatprep.subr.bf16.mxu1 %v1315_v38 }
0x11b4   :  { %v1228_v24 = vpop.eup %1227 }
0x11b5   :  { %941 = vrot.lane.b32.xlu1 %v1228_v24, %s1311_s3  ;;  %v1230_v26 = vpop.eup %1229  ;;  %1113 = vmatpush3.bf16.msra.mxu1 %v1170_v11 }
0x11b6   :  { %v934_v27 = vadd.f32 1.0, %v1230_v26 }
0x11b8   :  { %v936_v28 = vmul.f32 0.5, %v934_v27 }
0x11ba   :  { %v939_v35 = vmul.f32 %v936_v28, %v876_v2 }
0x1227   :  { %v942_v29 = vpop.permute.xlu1 %941 }
0x1228   :  { %v944_v31 = vmul.f32 %v942_v29, %v936_v28 }
0x122a   :  { %946 = vrot.lane.b32.xlu0 %v944_v31, %s1311_s3 }
0x129c   :  { %v947_v40 = vpop.permute.xlu0 %946 }
0x129d   :  { %v949_v41 = vadd.f32 %v947_v40, %v939_v35 }
0x129f   :  { %1231 = vtanh.f32 %v949_v41 }
0x12a0   :  { %1233 = vtanh.f32 %v931_v13 }
0x12a9   :  { %v1232_v0 = vpop.eup %1231 }
0x12aa   :  { %952 = vrot.lane.b32.xlu1 %v1232_v0, %s1311_s3  ;;  %v1234_v14 = vpop.eup %1233  ;;  %s1279_s3 = scalar_lea.vmem %s1047_s13, 128 }
0x12ab   :  { %v935_v16 = vadd.f32 1.0, %v1234_v14  ;;  %p1280_p2 = scmp.ne.s32.totalorder %s1047_s13, %s1279_s3  ;;  %p1285_p4 = scmp.lt.s32.totalorder %s1279_s3, %s1279_s3 }
0x12ad   :  { %v937_v18 = vmul.f32 0.5, %v935_v16  ;;  %p1286_p5 = por %p1285_p4, %p1284_p3 }
0x12af   :  { %p1287_p6 = pnand %p1286_p5, %p1280_p2 }
0x131c   :  { %v953_v42 = vpop.permute.xlu1 %952 }
0x131d   :  { %v955_v20 = vmul.f32 %v953_v42, %v937_v18 }
0x131f   :  { %v956_v10 = vpack.c.bf16 %v955_v20, %v955_v20 }
0x1321   :  { %1115 = vmatmul.mubr.msk.bf16.vlgmr.msra.gmra.mrb[20].mxu1 %vm372_vm7, %v956_v10 }
0x13f4   :  { %v1033_v33 = vpop.f32.mrb[20].mxu1 }
0x13f5   :  { %v1034_v43 = vadd.f32 %v1095_v23, %v1033_v33  ;;  %v1116_v34 = vpop.f32.mrb[21].mxu1 }
0x13f6   :  { %v1036_v44 = vpop.f32.mrb[22].mxu1 }
0x13f7   :  { %1039 = vst [vmem:[#allocation7] sm:$0xff] %v1034_v43  ;;  %v1117_v47 = vpop.f32.mrb[23].mxu1 }
0x13f8   :  { %1290 = shalt.err (!%p1287_p6)
}
0x13f9   :  { %s1291_s5 = scalar_lea.hbm %s1677_s6, 128 }
0x13fa   :  { %p1292_p7 = scmp.ne.s32.totalorder %s1677_s6, %s1291_s5  ;;  %p1295_p8 = scmp.lt.u32.totalorder %s1291_s5, %s1677_s6 }
0x13fc   :  { %p1297_p9 = pnand %p1295_p8, %p1292_p7 }
0x13fe   :  { %1300 = shalt.err (!%p1297_p9)
}
0x13ff   :  { %1049 = dma.vmem_to_hbm [thread:$0]  %s1047_s13, 128, %s1677_s6, [#allocation4]  }
0x1400   :  { %1305 = dma.done.wait [#allocation4], 128  }
0x1401   :  { %1306 = vsyncadd [#allocation4], 4294967168 }
0x1402   :  { %1053 = vsyncpa [#allocation3], 1 }
0x1403   :  { %1054 = vsyncpa [#allocation6], 1 }
0x1404   :  { %1055 = vsyncpa [#allocation4], 1 }

</bundles_post_ra>
